<compile_context>
chip_gen: v7x
topology: tpu7x:2x2x1
jax: 0.10.0
libtpu: 0.0.40
codegen_flags: <defaults>
</compile_context>

<pallas_src>
import jax
import jax.numpy as jnp
from jax.experimental import pallas as pl
from jax.experimental.pallas import tpu as pltpu


def lstm_fc_kernel(x_ref, wl_ref, wf_ref, out_ref):
    """Full single-layer LSTM recurrence + final Linear, resident in VMEM.

    x_ref  : (T*B, I)        time-major flattened input (row t*B + b = (t, b))
    wl_ref : (pad_I+H+1, 4H) packed [W_ih^T ; pad ; W_hh^T ; (b_ih+b_hh)],
                             gate order [f, i, g, o]
    wf_ref : (H+1, O)        packed [W_fc^T ; b_fc]
    out_ref: (B, O)
    """
    TB, I = x_ref.shape
    B, O = out_ref.shape
    T = TB // B
    pad_i = ((I + 7) // 8) * 8
    H = wl_ref.shape[1] // 4

    # Unpack parameters once (static, sublane-aligned slices; off the
    # recurrent critical path).
    wih = wl_ref[0:I, :]                          # (I, 4H)
    whh = wl_ref[pad_i:pad_i + H, :]              # (H, 4H)
    bias = wl_ref[pad_i + H:pad_i + H + 1, :]     # (1, 4H)
    wfc = wf_ref[0:H, :]                          # (H, O)
    bfc = wf_ref[H:H + 1, :]                      # (1, O)

    # Fused input projection: ONE MXU pass for all timesteps + one bias add.
    # Independent of h, so it sits entirely off the recurrent critical path.
    xw_all = (jnp.dot(x_ref[...], wih, preferred_element_type=jnp.float32)
              + bias)                             # (T*B, 4H)

    h = jnp.zeros((B, H), jnp.float32)
    c = jnp.zeros((B, H), jnp.float32)

    def step(xw_t, h, c):
        gates = xw_t + jnp.dot(h, whh, preferred_element_type=jnp.float32)
        # Full-width activations on the EUP (4H == 128 lanes == one vreg),
        # then slice once.  Gate order [f, i, g, o]: forget gate at lane
        # offset 0, i.e. no XLU rotate on the serial c-chain.
        sig = jax.nn.sigmoid(gates)
        tg = jnp.tanh(gates)
        f_g = sig[:, 0 * H:1 * H]
        i_g = sig[:, 1 * H:2 * H]
        g_g = tg[:, 2 * H:3 * H]
        o_g = sig[:, 3 * H:4 * H]
        c = f_g * c + i_g * g_g
        h = o_g * jnp.tanh(c)
        return h, c

    if T <= 16:
        # Fully unrolled: state stays in vregs, xw rows are free static slices.
        for t in range(T):
            h, c = step(xw_all[t * B:(t + 1) * B, :], h, c)
    else:
        # Guard against vreg-pressure blowup for long sequences.
        def body(t, hc):
            h, c = hc
            xw_t = jax.lax.dynamic_slice_in_dim(xw_all, t * B, B, axis=0)
            return step(xw_t, h, c)
        h, c = jax.lax.fori_loop(0, T, body, (h, c))

    # fc on the last hidden state (== out[:, -1, :] of the PyTorch LSTM)
    out_ref[...] = (jnp.dot(h, wfc, preferred_element_type=jnp.float32) + bfc)


def prepare_params(params):
    """One-time parameter prep: transpose, cast, combine biases, reorder the
    gate columns [i,f,g,o] -> [f,i,g,o], and pack into two buffers."""
    w_ih, w_hh, b_ih, b_hh, w_fc, b_fc = (
        params["w_ih"], params["w_hh"], params["b_ih"], params["b_hh"],
        params["w_fc"], params["b_fc"])
    H4, I = w_ih.shape
    H = H4 // 4
    O = w_fc.shape[0]
    pad_i = ((I + 7) // 8) * 8

    # PyTorch gate order [i, f, g, o] -> kernel order [f, i, g, o]
    perm = jnp.concatenate([jnp.arange(H, 2 * H), jnp.arange(0, H),
                            jnp.arange(2 * H, 3 * H), jnp.arange(3 * H, 4 * H)])
    wih_t = jnp.transpose(w_ih[perm]).astype(jnp.float32)     # (I, 4H)
    whh_t = jnp.transpose(w_hh[perm]).astype(jnp.float32)     # (H, 4H)
    b = (b_ih + b_hh)[perm].astype(jnp.float32)               # (4H,)

    # Packed LSTM buffer, sublane-aligned row offsets (0, pad_I, pad_I+H).
    w_lstm = jnp.zeros((pad_i + H + 1, 4 * H), jnp.float32)
    w_lstm = w_lstm.at[:I, :].set(wih_t)
    w_lstm = w_lstm.at[pad_i:pad_i + H, :].set(whh_t)
    w_lstm = w_lstm.at[pad_i + H, :].set(b)

    # Packed FC buffer: [W_fc^T ; b_fc].
    w_fc_pack = jnp.zeros((H + 1, O), jnp.float32)
    w_fc_pack = w_fc_pack.at[:H, :].set(jnp.transpose(w_fc).astype(jnp.float32))
    w_fc_pack = w_fc_pack.at[H, :].set(b_fc.astype(jnp.float32))
    return w_lstm, w_fc_pack


@jax.jit
def bandwidth_allocator_forward(x, w_lstm, w_fc_pack):
    """x: (batch, seq, input_size) float32, batch_first like PyTorch."""
    B, T, I = x.shape
    O = w_fc_pack.shape[1]
    # Time-major flatten so row t*B + b is (timestep t, batch b); fuses with
    # the surrounding jit, and lets the kernel do ONE input-projection matmul.
    x_flat = jnp.transpose(x, (1, 0, 2)).reshape(T * B, I).astype(jnp.float32)

    # TODO(synk): for throughput workloads (many concurrent sequences), raise B
    # (B=2 fills 2/8 f32 sublanes for free) and add a batch-tile grid axis with
    # dimension_semantics=("parallel",) to use both v7x TensorCores; at B=2 a
    # single grid point on one TC is optimal.
    vmem = pl.BlockSpec(memory_space=pltpu.MemorySpace.VMEM)
    return pl.pallas_call(
        lstm_fc_kernel,
        out_shape=jax.ShapeDtypeStruct((B, O), jnp.float32),
        in_specs=[vmem, vmem, vmem],
        out_specs=vmem,
    )(x_flat, w_lstm, w_fc_pack)


def reference_forward(x, params):
    """Pure-JAX reference matching torch.nn.LSTM + nn.Linear semantics."""
    w_ih, w_hh, b_ih, b_hh, w_fc, b_fc = (
        params["w_ih"], params["w_hh"], params["b_ih"], params["b_hh"],
        params["w_fc"], params["b_fc"])
    B, T, I = x.shape
    H = w_hh.shape[1]
    h = jnp.zeros((B, H), jnp.float32)
    c = jnp.zeros((B, H), jnp.float32)
    for t in range(T):
        gates = x[:, t, :] @ w_ih.T + b_ih + h @ w_hh.T + b_hh
        i_g = jax.nn.sigmoid(gates[:, 0 * H:1 * H])
        f_g = jax.nn.sigmoid(gates[:, 1 * H:2 * H])
        g_g = jnp.tanh(gates[:, 2 * H:3 * H])
        o_g = jax.nn.sigmoid(gates[:, 3 * H:4 * H])
        c = f_g * c + i_g * g_g
        h = o_g * jnp.tanh(c)
    return h @ w_fc.T + b_fc


def init_params(key, input_size, hidden_size, output_size):
    """Deterministic init mimicking PyTorch's U(-1/sqrt(H), 1/sqrt(H))."""
    ks = jax.random.split(key, 6)
    k_lstm = 1.0 / jnp.sqrt(hidden_size)
    k_fc = 1.0 / jnp.sqrt(hidden_size)
    u = lambda k, shape, s: jax.random.uniform(k, shape, jnp.float32, -s, s)
    return {
        "w_ih": u(ks[0], (4 * hidden_size, input_size), k_lstm),
        "w_hh": u(ks[1], (4 * hidden_size, hidden_size), k_lstm),
        "b_ih": u(ks[2], (4 * hidden_size,), k_lstm),
        "b_hh": u(ks[3], (4 * hidden_size,), k_lstm),
        "w_fc": u(ks[4], (output_size, hidden_size), k_fc),
        "b_fc": u(ks[5], (output_size,), k_fc),
    }


if __name__ == "__main__":
    batch, seq, input_size, hidden_size, output_size = 2, 8, 4, 32, 4

    key = jax.random.PRNGKey(0)
    k_x, k_p = jax.random.split(key)
    x = jax.random.normal(k_x, (batch, seq, input_size), jnp.float32)
    params = init_params(k_p, input_size, hidden_size, output_size)

    # One-time parameter prep (reused across all forward calls).
    w_lstm, w_fc_pack = prepare_params(params)
    w_lstm, w_fc_pack = jax.block_until_ready((w_lstm, w_fc_pack))

    out = bandwidth_allocator_forward(x, w_lstm, w_fc_pack)
    out = jax.block_until_ready(out)

    ref = reference_forward(x, params)
    assert out.shape == (batch, output_size)
    assert jnp.allclose(out, ref, atol=1e-5, rtol=1e-5), (
        f"mismatch: max abs err {jnp.max(jnp.abs(out - ref))}")

    print("KERNEL_OK")
</pallas_src>

<mosaic_0001>
module attributes {stable_mosaic.version = 11 : i64} {
  func.func @lstm_fc_kernel(%arg0: memref<16x4xf32, #tpu.memory_space<vmem>>, %arg1: memref<41x128xf32, #tpu.memory_space<vmem>>, %arg2: memref<33x4xf32, #tpu.memory_space<vmem>>, %arg3: memref<2x4xf32, #tpu.memory_space<vmem>>) attributes {dimension_semantics = [], scalar_prefetch = 0 : i64, scratch_operands = 0 : i64, tpu.core_type = #tpu.core_type<tc>} {
    %c0 = arith.constant 0 : index
    %c0_0 = arith.constant 0 : index
    %0 = vector.load %arg1[%c0, %c0_0] : memref<41x128xf32, #tpu.memory_space<vmem>>, vector<4x128xf32>
    %c8 = arith.constant 8 : index
    %c0_1 = arith.constant 0 : index
    %1 = vector.load %arg1[%c8, %c0_1] : memref<41x128xf32, #tpu.memory_space<vmem>>, vector<32x128xf32>
    %c40 = arith.constant 40 : index
    %c0_2 = arith.constant 0 : index
    %2 = vector.load %arg1[%c40, %c0_2] : memref<41x128xf32, #tpu.memory_space<vmem>>, vector<1x128xf32>
    %c0_3 = arith.constant 0 : index
    %c0_4 = arith.constant 0 : index
    %3 = vector.load %arg2[%c0_3, %c0_4] : memref<33x4xf32, #tpu.memory_space<vmem>>, vector<32x4xf32>
    %c32 = arith.constant 32 : index
    %c0_5 = arith.constant 0 : index
    %4 = vector.load %arg2[%c32, %c0_5] : memref<33x4xf32, #tpu.memory_space<vmem>>, vector<1x4xf32>
    %c0_6 = arith.constant 0 : index
    %c0_7 = arith.constant 0 : index
    %5 = vector.load %arg0[%c0_6, %c0_7] : memref<16x4xf32, #tpu.memory_space<vmem>>, vector<16x4xf32>
    %cst = arith.constant dense<0.000000e+00> : vector<16x128xf32>
    %6 = tpu.matmul %5, %0, %cst {dimension_numbers = #tpu.dot_dimension_numbers<[1], [0], [0], [1], [0, 0, 1, 1], [], []>} : vector<16x4xf32>, vector<4x128xf32>, vector<16x128xf32> -> vector<16x128xf32>
    %7 = vector.broadcast %2 : vector<1x128xf32> to vector<16x128xf32>
    %8 = arith.addf %6, %7 : vector<16x128xf32>
    %cst_8 = arith.constant 0.000000e+00 : f32
    %9 = vector.broadcast %cst_8 : f32 to vector<2x32xf32>
    %cst_9 = arith.constant 0.000000e+00 : f32
    %10 = vector.broadcast %cst_9 : f32 to vector<2x32xf32>
    %11 = vector.extract_strided_slice %8 {offsets = [0, 0], sizes = [2, 128], strides = [1, 1]} : vector<16x128xf32> to vector<2x128xf32>
    %cst_10 = arith.constant dense<0.000000e+00> : vector<2x128xf32>
    %12 = tpu.matmul %9, %1, %cst_10 {dimension_numbers = #tpu.dot_dimension_numbers<[1], [0], [0], [1], [0, 0, 1, 1], [], []>} : vector<2x32xf32>, vector<32x128xf32>, vector<2x128xf32> -> vector<2x128xf32>
    %13 = arith.addf %11, %12 : vector<2x128xf32>
    %14 = arith.negf %13 : vector<2x128xf32>
    %15 = math.exp %14 : vector<2x128xf32>
    %cst_11 = arith.constant 1.000000e+00 : f32
    %16 = vector.broadcast %cst_11 : f32 to vector<2x128xf32>
    %17 = arith.addf %16, %15 : vector<2x128xf32>
    %18 = arith.divf %16, %17 : vector<2x128xf32>
    %19 = math.tanh %13 : vector<2x128xf32>
    %20 = vector.extract_strided_slice %18 {offsets = [0, 0], sizes = [2, 32], strides = [1, 1]} : vector<2x128xf32> to vector<2x32xf32>
    %21 = vector.extract_strided_slice %18 {offsets = [0, 32], sizes = [2, 32], strides = [1, 1]} : vector<2x128xf32> to vector<2x32xf32>
    %22 = vector.extract_strided_slice %19 {offsets = [0, 64], sizes = [2, 32], strides = [1, 1]} : vector<2x128xf32> to vector<2x32xf32>
    %23 = vector.extract_strided_slice %18 {offsets = [0, 96], sizes = [2, 32], strides = [1, 1]} : vector<2x128xf32> to vector<2x32xf32>
    %24 = arith.mulf %20, %10 : vector<2x32xf32>
    %25 = arith.mulf %21, %22 : vector<2x32xf32>
    %26 = arith.addf %24, %25 : vector<2x32xf32>
    %27 = math.tanh %26 : vector<2x32xf32>
    %28 = arith.mulf %23, %27 : vector<2x32xf32>
    %29 = vector.extract_strided_slice %8 {offsets = [2, 0], sizes = [2, 128], strides = [1, 1]} : vector<16x128xf32> to vector<2x128xf32>
    %cst_12 = arith.constant dense<0.000000e+00> : vector<2x128xf32>
    %30 = tpu.matmul %28, %1, %cst_12 {dimension_numbers = #tpu.dot_dimension_numbers<[1], [0], [0], [1], [0, 0, 1, 1], [], []>} : vector<2x32xf32>, vector<32x128xf32>, vector<2x128xf32> -> vector<2x128xf32>
    %31 = arith.addf %29, %30 : vector<2x128xf32>
    %32 = arith.negf %31 : vector<2x128xf32>
    %33 = math.exp %32 : vector<2x128xf32>
    %cst_13 = arith.constant 1.000000e+00 : f32
    %34 = vector.broadcast %cst_13 : f32 to vector<2x128xf32>
    %35 = arith.addf %34, %33 : vector<2x128xf32>
    %36 = arith.divf %34, %35 : vector<2x128xf32>
    %37 = math.tanh %31 : vector<2x128xf32>
    %38 = vector.extract_strided_slice %36 {offsets = [0, 0], sizes = [2, 32], strides = [1, 1]} : vector<2x128xf32> to vector<2x32xf32>
    %39 = vector.extract_strided_slice %36 {offsets = [0, 32], sizes = [2, 32], strides = [1, 1]} : vector<2x128xf32> to vector<2x32xf32>
    %40 = vector.extract_strided_slice %37 {offsets = [0, 64], sizes = [2, 32], strides = [1, 1]} : vector<2x128xf32> to vector<2x32xf32>
    %41 = vector.extract_strided_slice %36 {offsets = [0, 96], sizes = [2, 32], strides = [1, 1]} : vector<2x128xf32> to vector<2x32xf32>
    %42 = arith.mulf %38, %26 : vector<2x32xf32>
    %43 = arith.mulf %39, %40 : vector<2x32xf32>
    %44 = arith.addf %42, %43 : vector<2x32xf32>
    %45 = math.tanh %44 : vector<2x32xf32>
    %46 = arith.mulf %41, %45 : vector<2x32xf32>
    %47 = vector.extract_strided_slice %8 {offsets = [4, 0], sizes = [2, 128], strides = [1, 1]} : vector<16x128xf32> to vector<2x128xf32>
    %cst_14 = arith.constant dense<0.000000e+00> : vector<2x128xf32>
    %48 = tpu.matmul %46, %1, %cst_14 {dimension_numbers = #tpu.dot_dimension_numbers<[1], [0], [0], [1], [0, 0, 1, 1], [], []>} : vector<2x32xf32>, vector<32x128xf32>, vector<2x128xf32> -> vector<2x128xf32>
    %49 = arith.addf %47, %48 : vector<2x128xf32>
    %50 = arith.negf %49 : vector<2x128xf32>
    %51 = math.exp %50 : vector<2x128xf32>
    %cst_15 = arith.constant 1.000000e+00 : f32
    %52 = vector.broadcast %cst_15 : f32 to vector<2x128xf32>
    %53 = arith.addf %52, %51 : vector<2x128xf32>
    %54 = arith.divf %52, %53 : vector<2x128xf32>
    %55 = math.tanh %49 : vector<2x128xf32>
    %56 = vector.extract_strided_slice %54 {offsets = [0, 0], sizes = [2, 32], strides = [1, 1]} : vector<2x128xf32> to vector<2x32xf32>
    %57 = vector.extract_strided_slice %54 {offsets = [0, 32], sizes = [2, 32], strides = [1, 1]} : vector<2x128xf32> to vector<2x32xf32>
    %58 = vector.extract_strided_slice %55 {offsets = [0, 64], sizes = [2, 32], strides = [1, 1]} : vector<2x128xf32> to vector<2x32xf32>
    %59 = vector.extract_strided_slice %54 {offsets = [0, 96], sizes = [2, 32], strides = [1, 1]} : vector<2x128xf32> to vector<2x32xf32>
    %60 = arith.mulf %56, %44 : vector<2x32xf32>
    %61 = arith.mulf %57, %58 : vector<2x32xf32>
    %62 = arith.addf %60, %61 : vector<2x32xf32>
    %63 = math.tanh %62 : vector<2x32xf32>
    %64 = arith.mulf %59, %63 : vector<2x32xf32>
    %65 = vector.extract_strided_slice %8 {offsets = [6, 0], sizes = [2, 128], strides = [1, 1]} : vector<16x128xf32> to vector<2x128xf32>
    %cst_16 = arith.constant dense<0.000000e+00> : vector<2x128xf32>
    %66 = tpu.matmul %64, %1, %cst_16 {dimension_numbers = #tpu.dot_dimension_numbers<[1], [0], [0], [1], [0, 0, 1, 1], [], []>} : vector<2x32xf32>, vector<32x128xf32>, vector<2x128xf32> -> vector<2x128xf32>
    %67 = arith.addf %65, %66 : vector<2x128xf32>
    %68 = arith.negf %67 : vector<2x128xf32>
    %69 = math.exp %68 : vector<2x128xf32>
    %cst_17 = arith.constant 1.000000e+00 : f32
    %70 = vector.broadcast %cst_17 : f32 to vector<2x128xf32>
    %71 = arith.addf %70, %69 : vector<2x128xf32>
    %72 = arith.divf %70, %71 : vector<2x128xf32>
    %73 = math.tanh %67 : vector<2x128xf32>
    %74 = vector.extract_strided_slice %72 {offsets = [0, 0], sizes = [2, 32], strides = [1, 1]} : vector<2x128xf32> to vector<2x32xf32>
    %75 = vector.extract_strided_slice %72 {offsets = [0, 32], sizes = [2, 32], strides = [1, 1]} : vector<2x128xf32> to vector<2x32xf32>
    %76 = vector.extract_strided_slice %73 {offsets = [0, 64], sizes = [2, 32], strides = [1, 1]} : vector<2x128xf32> to vector<2x32xf32>
    %77 = vector.extract_strided_slice %72 {offsets = [0, 96], sizes = [2, 32], strides = [1, 1]} : vector<2x128xf32> to vector<2x32xf32>
    %78 = arith.mulf %74, %62 : vector<2x32xf32>
    %79 = arith.mulf %75, %76 : vector<2x32xf32>
    %80 = arith.addf %78, %79 : vector<2x32xf32>
    %81 = math.tanh %80 : vector<2x32xf32>
    %82 = arith.mulf %77, %81 : vector<2x32xf32>
    %83 = vector.extract_strided_slice %8 {offsets = [8, 0], sizes = [2, 128], strides = [1, 1]} : vector<16x128xf32> to vector<2x128xf32>
    %cst_18 = arith.constant dense<0.000000e+00> : vector<2x128xf32>
    %84 = tpu.matmul %82, %1, %cst_18 {dimension_numbers = #tpu.dot_dimension_numbers<[1], [0], [0], [1], [0, 0, 1, 1], [], []>} : vector<2x32xf32>, vector<32x128xf32>, vector<2x128xf32> -> vector<2x128xf32>
    %85 = arith.addf %83, %84 : vector<2x128xf32>
    %86 = arith.negf %85 : vector<2x128xf32>
    %87 = math.exp %86 : vector<2x128xf32>
    %cst_19 = arith.constant 1.000000e+00 : f32
    %88 = vector.broadcast %cst_19 : f32 to vector<2x128xf32>
    %89 = arith.addf %88, %87 : vector<2x128xf32>
    %90 = arith.divf %88, %89 : vector<2x128xf32>
    %91 = math.tanh %85 : vector<2x128xf32>
    %92 = vector.extract_strided_slice %90 {offsets = [0, 0], sizes = [2, 32], strides = [1, 1]} : vector<2x128xf32> to vector<2x32xf32>
    %93 = vector.extract_strided_slice %90 {offsets = [0, 32], sizes = [2, 32], strides = [1, 1]} : vector<2x128xf32> to vector<2x32xf32>
    %94 = vector.extract_strided_slice %91 {offsets = [0, 64], sizes = [2, 32], strides = [1, 1]} : vector<2x128xf32> to vector<2x32xf32>
    %95 = vector.extract_strided_slice %90 {offsets = [0, 96], sizes = [2, 32], strides = [1, 1]} : vector<2x128xf32> to vector<2x32xf32>
    %96 = arith.mulf %92, %80 : vector<2x32xf32>
    %97 = arith.mulf %93, %94 : vector<2x32xf32>
    %98 = arith.addf %96, %97 : vector<2x32xf32>
    %99 = math.tanh %98 : vector<2x32xf32>
    %100 = arith.mulf %95, %99 : vector<2x32xf32>
    %101 = vector.extract_strided_slice %8 {offsets = [10, 0], sizes = [2, 128], strides = [1, 1]} : vector<16x128xf32> to vector<2x128xf32>
    %cst_20 = arith.constant dense<0.000000e+00> : vector<2x128xf32>
    %102 = tpu.matmul %100, %1, %cst_20 {dimension_numbers = #tpu.dot_dimension_numbers<[1], [0], [0], [1], [0, 0, 1, 1], [], []>} : vector<2x32xf32>, vector<32x128xf32>, vector<2x128xf32> -> vector<2x128xf32>
    %103 = arith.addf %101, %102 : vector<2x128xf32>
    %104 = arith.negf %103 : vector<2x128xf32>
    %105 = math.exp %104 : vector<2x128xf32>
    %cst_21 = arith.constant 1.000000e+00 : f32
    %106 = vector.broadcast %cst_21 : f32 to vector<2x128xf32>
    %107 = arith.addf %106, %105 : vector<2x128xf32>
    %108 = arith.divf %106, %107 : vector<2x128xf32>
    %109 = math.tanh %103 : vector<2x128xf32>
    %110 = vector.extract_strided_slice %108 {offsets = [0, 0], sizes = [2, 32], strides = [1, 1]} : vector<2x128xf32> to vector<2x32xf32>
    %111 = vector.extract_strided_slice %108 {offsets = [0, 32], sizes = [2, 32], strides = [1, 1]} : vector<2x128xf32> to vector<2x32xf32>
    %112 = vector.extract_strided_slice %109 {offsets = [0, 64], sizes = [2, 32], strides = [1, 1]} : vector<2x128xf32> to vector<2x32xf32>
    %113 = vector.extract_strided_slice %108 {offsets = [0, 96], sizes = [2, 32], strides = [1, 1]} : vector<2x128xf32> to vector<2x32xf32>
    %114 = arith.mulf %110, %98 : vector<2x32xf32>
    %115 = arith.mulf %111, %112 : vector<2x32xf32>
    %116 = arith.addf %114, %115 : vector<2x32xf32>
    %117 = math.tanh %116 : vector<2x32xf32>
    %118 = arith.mulf %113, %117 : vector<2x32xf32>
    %119 = vector.extract_strided_slice %8 {offsets = [12, 0], sizes = [2, 128], strides = [1, 1]} : vector<16x128xf32> to vector<2x128xf32>
    %cst_22 = arith.constant dense<0.000000e+00> : vector<2x128xf32>
    %120 = tpu.matmul %118, %1, %cst_22 {dimension_numbers = #tpu.dot_dimension_numbers<[1], [0], [0], [1], [0, 0, 1, 1], [], []>} : vector<2x32xf32>, vector<32x128xf32>, vector<2x128xf32> -> vector<2x128xf32>
    %121 = arith.addf %119, %120 : vector<2x128xf32>
    %122 = arith.negf %121 : vector<2x128xf32>
    %123 = math.exp %122 : vector<2x128xf32>
    %cst_23 = arith.constant 1.000000e+00 : f32
    %124 = vector.broadcast %cst_23 : f32 to vector<2x128xf32>
    %125 = arith.addf %124, %123 : vector<2x128xf32>
    %126 = arith.divf %124, %125 : vector<2x128xf32>
    %127 = math.tanh %121 : vector<2x128xf32>
    %128 = vector.extract_strided_slice %126 {offsets = [0, 0], sizes = [2, 32], strides = [1, 1]} : vector<2x128xf32> to vector<2x32xf32>
    %129 = vector.extract_strided_slice %126 {offsets = [0, 32], sizes = [2, 32], strides = [1, 1]} : vector<2x128xf32> to vector<2x32xf32>
    %130 = vector.extract_strided_slice %127 {offsets = [0, 64], sizes = [2, 32], strides = [1, 1]} : vector<2x128xf32> to vector<2x32xf32>
    %131 = vector.extract_strided_slice %126 {offsets = [0, 96], sizes = [2, 32], strides = [1, 1]} : vector<2x128xf32> to vector<2x32xf32>
    %132 = arith.mulf %128, %116 : vector<2x32xf32>
    %133 = arith.mulf %129, %130 : vector<2x32xf32>
    %134 = arith.addf %132, %133 : vector<2x32xf32>
    %135 = math.tanh %134 : vector<2x32xf32>
    %136 = arith.mulf %131, %135 : vector<2x32xf32>
    %137 = vector.extract_strided_slice %8 {offsets = [14, 0], sizes = [2, 128], strides = [1, 1]} : vector<16x128xf32> to vector<2x128xf32>
    %cst_24 = arith.constant dense<0.000000e+00> : vector<2x128xf32>
    %138 = tpu.matmul %136, %1, %cst_24 {dimension_numbers = #tpu.dot_dimension_numbers<[1], [0], [0], [1], [0, 0, 1, 1], [], []>} : vector<2x32xf32>, vector<32x128xf32>, vector<2x128xf32> -> vector<2x128xf32>
    %139 = arith.addf %137, %138 : vector<2x128xf32>
    %140 = arith.negf %139 : vector<2x128xf32>
    %141 = math.exp %140 : vector<2x128xf32>
    %cst_25 = arith.constant 1.000000e+00 : f32
    %142 = vector.broadcast %cst_25 : f32 to vector<2x128xf32>
    %143 = arith.addf %142, %141 : vector<2x128xf32>
    %144 = arith.divf %142, %143 : vector<2x128xf32>
    %145 = math.tanh %139 : vector<2x128xf32>
    %146 = vector.extract_strided_slice %144 {offsets = [0, 0], sizes = [2, 32], strides = [1, 1]} : vector<2x128xf32> to vector<2x32xf32>
    %147 = vector.extract_strided_slice %144 {offsets = [0, 32], sizes = [2, 32], strides = [1, 1]} : vector<2x128xf32> to vector<2x32xf32>
    %148 = vector.extract_strided_slice %145 {offsets = [0, 64], sizes = [2, 32], strides = [1, 1]} : vector<2x128xf32> to vector<2x32xf32>
    %149 = vector.extract_strided_slice %144 {offsets = [0, 96], sizes = [2, 32], strides = [1, 1]} : vector<2x128xf32> to vector<2x32xf32>
    %150 = arith.mulf %146, %134 : vector<2x32xf32>
    %151 = arith.mulf %147, %148 : vector<2x32xf32>
    %152 = arith.addf %150, %151 : vector<2x32xf32>
    %153 = math.tanh %152 : vector<2x32xf32>
    %154 = arith.mulf %149, %153 : vector<2x32xf32>
    %cst_26 = arith.constant dense<0.000000e+00> : vector<2x4xf32>
    %155 = tpu.matmul %154, %3, %cst_26 {dimension_numbers = #tpu.dot_dimension_numbers<[1], [0], [0], [1], [0, 0, 1, 1], [], []>} : vector<2x32xf32>, vector<32x4xf32>, vector<2x4xf32> -> vector<2x4xf32>
    %156 = vector.broadcast %4 : vector<1x4xf32> to vector<2x4xf32>
    %157 = arith.addf %155, %156 : vector<2x4xf32>
    %c0_27 = arith.constant 0 : index
    %c0_28 = arith.constant 0 : index
    %158 = vector.load %arg3[%c0_27, %c0_28] : memref<2x4xf32, #tpu.memory_space<vmem>>, vector<2x4xf32>
    tpu.vector_store %arg3[%c0_27, %c0_28], %157 {strides = array<i32>} : memref<2x4xf32, #tpu.memory_space<vmem>>, vector<2x4xf32>,
    return
  }
}

</mosaic_0001>

<bundles_post_ra>
// kernel: bandwidth_allocator_forward.1
= control target key start
LH: loop header
LB: loop body
LE: loop exit
PB: predicated region body
PF: predicated region fallthrough
CT: control target
= control target key end

     0   :  { %vm39_vm0 = vcmask 1043456   ;;  %v1378_v3 = vmov 0.0|0.0   ;;  %vm32_vm1 = vcmask 31744   ;;  %s1564_s0 = inlined_call_operand.vmem [shape: f32[16,4], index: 0, kind: input, shape index: {}]   ;;  %s1565_s1 = inlined_call_operand.vmem [shape: f32[41,128], index: 1, kind: input, shape index: {}]   ;;  %s1566_s2 = inlined_call_operand.vmem [shape: f32[33,4], index: 2, kind: input, shape index: {}]   ;;  %s1567_s3 = inlined_call_operand.hbm [shape: f32[2,4], index: 3, kind: output, shape index: {}]  }
   0x1   :  { %v16_v0 = vld [vmem:[%s1565_s1 + $0x8] sm:$0xff]  ;;  %v17_v1 = vld [vmem:[%s1565_s1 + $0x10] sm:$0xff]  ;;  %v15_v2 = vld [vmem:[%s1565_s1] sm:$0xf]  ;;  %1230 = vmatprep.subr.bf16.mxu1 %v1378_v3 }
   0x2   :  { %v1414_v4 = vpack.c.bf16 %v17_v1, %v16_v0  ;;  %1126 = vmatprep.subr.msk.mxu0 %vm39_vm0, %v15_v2  ;;  %v26_v5 = vld [vmem:[%s1564_s0] sm:$0xff]  ;;  %v27_v6 = vld [vmem:[%s1564_s0 + $0x8] sm:$0xff]  ;;  %v18_v7 = vld [vmem:[%s1565_s1 + $0x18] sm:$0xff] }
   0x3   :  { %1127 = vmatpush3.msk.msra.mxu0 %vm39_vm0, %v15_v2  ;;  %1128 = vmatprep.mubr.msk.f32.mxu0 %vm32_vm1, %v26_v5  ;;  %v19_v8 = vld [vmem:[%s1565_s1 + $0x20] sm:$0xff] }
   0x4   :  { %8 = vsyncpa [#allocation3], 0  ;;  %1232 = vmatpush3.bf16.msra.mxu1 %v1414_v4  ;;  %1129 = vmatmul.mubr.msk.f32.vlgmr.msra.gmra.mrb[0].mxu0 %vm32_vm1, %v27_v6  ;;  %v1429_v9 = vpack.c.bf16 %v19_v8, %v18_v7  ;;  %vm1379_vm2 = vmmov 0   ;;  %v1380_v10 = vmov 0.0   ;;  %v1057_v11 = vld [vmem:[%s1565_s1 + $0x28] ss:$0 sm:$0xff] }
   0x5   :  { %1233 = vmatprep.subr.bf16.mxu1 %v1378_v3  ;;  %1139 = vmatprep.mubr.msk.f32.mxu1 %vm1379_vm2, %v1380_v10  ;;  %s1381_s27 = smov 96   ;;  %s1382_s1 = smov 32   ;;  %vm118_vm3 = vcmask 261120   ;;  %vm1041_vm4 = vcmask 25600  }
   0x6   :  { %1236 = vmatprep.subr.bf16.mxu0 %v1378_v3  ;;  %1150 = vmatprep.mubr.msk.f32.mxu0 %vm1379_vm2, %v1380_v10  ;;  %s1383_s11 = smov [#allocation2]  }
   0x7   :  { %1238 = vmatpush3.bf16.msra.mxu0 %v1414_v4  ;;  %s1049_s12 = sshll.u32 %s1383_s11, 4  ;;  %s1050_s12 = int_to_ptr.vmem [resolvable:$true] %s1049_s12 }
   0x8   :  { %1235 = vmatpush3.bf16.msra.mxu1 %v1429_v9  ;;  %1239 = vmatprep.subr.bf16.mxu0 %v1378_v3  ;;  %s1354_s13 = scalar_lea.vmem %s1050_s12, 32  ;;  %p1359_p1 = scmp.lt.s32.totalorder %s1050_s12, %s1050_s12 }
   0x9   :  { %1242 = vmatprep.subr.bf16.mxu1 %v1378_v3  ;;  %p1355_p0 = scmp.ne.s32.totalorder %s1050_s12, %s1354_s13  ;;  %p1360_p2 = scmp.lt.s32.totalorder %s1354_s13, %s1354_s13 }
   0xb   :  { %1140 = vmatmul.mubr.f32.vlgmr.msra.gmra.mrb[0].mxu1 %v1380_v10  ;;  %1241 = vmatpush3.bf16.msra.mxu0 %v1429_v9  ;;  %p1361_p3 = por %p1360_p2, %p1359_p1 }
   0xc   :  { %1244 = vmatpush3.bf16.msra.mxu1 %v1414_v4  ;;  %1161 = vmatprep.mubr.msk.f32.mxu1 %vm1379_vm2, %v1380_v10 }
   0xd   :  { %1245 = vmatprep.subr.bf16.mxu1 %v1378_v3  ;;  %1248 = vmatprep.subr.bf16.mxu0 %v1378_v3  ;;  %p1362_p4 = pnand %p1361_p3, %p1355_p0 }
  0x10   :  { %1247 = vmatpush3.bf16.msra.mxu1 %v1429_v9 }
  0x11   :  { %1254 = vmatprep.subr.bf16.mxu1 %v1378_v3 }
  0xd7   :  { %v1130_v12 = vpop.f32.mrb[0].mxu0 }
  0xd8   :  { %v1453_v13 = vadd.f32 %v1130_v12, %v1057_v11  ;;  %v109_v14 = vpop.f32.mrb[1].mxu0 }
  0xd9   :  { %v1455_v15 = vadd.f32 %v1057_v11, %v109_v14 }
  0xde   :  { %v188_v16 = vpop.f32.mrb[0].mxu1 }
  0xdf   :  { %v192_v17 = vadd.f32 %v188_v16, %v1455_v15  ;;  %v1141_v18 = vpop.f32.mrb[1].mxu1 }
  0xe1   :  { %1290 = vtanh.f32 %v192_v17  ;;  %v1061_v20 = vmul.f32 -1.442695, %v192_v17 }
  0xe3   :  { %1292 = vpow2.f32 %v1061_v20 }
  0xeb   :  { %v1291_v19 = vpop.eup %1290 }
  0xec   :  { %202 = vrot.lane.b32.xlu0 %v1291_v19, %s1381_s27 }
  0xed   :  { %v1293_v21 = vpop.eup %1292 }
  0xee   :  { %v196_v22 = vadd.f32 1.0, %v1293_v21 }
  0xf0   :  { %1294 = vrcp.f32 %v196_v22 }
  0xfa   :  { %v1295_v23 = vpop.eup %1294 }
  0xfb   :  { %v200_v26 = vmul.f32 0.0, %v1295_v23 }
 0x15e   :  { %v203_v24 = vpop.permute.xlu0 %202 }
 0x15f   :  { %v205_v25 = vmul.f32 %v1295_v23, %v203_v24 }
 0x161   :  { %207 = vrot.lane.b32.xlu0 %v205_v25, %s1381_s27 }
 0x1d3   :  { %v208_v27 = vpop.permute.xlu0 %207 }
 0x1d4   :  { %v210_v28 = vadd.f32 %v208_v27, %v200_v26 }
 0x1d6   :  { %1296 = vtanh.f32 %v210_v28  ;;  %v304_v44 = vrot.slane %v210_v28, 6 }
 0x1e0   :  { %v1297_v29 = vpop.eup %1296 }
 0x1e1   :  { %213 = vrot.lane.b32.xlu1 %v1297_v29, %s1381_s27 }
 0x253   :  { %v214_v30 = vpop.permute.xlu1 %213 }
 0x254   :  { %v216_v31 = vmul.f32 %v1295_v23, %v214_v30 }
 0x256   :  { %218 = vrot.lane.b32.xlu1 %v216_v31, %s1382_s1 }
 0x2c8   :  { %v219_v32 = vpop.permute.xlu1 %218 }
 0x2c9   :  { %1151 = vmatmul.mubr.msk.f32.vlgmr.msra.gmra.mrb[2].mxu0 %vm118_vm3, %v219_v32 }
 0x2ca   :  { %1250 = vmatpush3.bf16.msra.mxu0 %v1414_v4  ;;  %1172 = vmatprep.mubr.msk.f32.mxu0 %vm1379_vm2, %v1380_v10 }
 0x2cb   :  { %1251 = vmatprep.subr.bf16.mxu0 %v1378_v3 }
 0x2ce   :  { %1253 = vmatpush3.bf16.msra.mxu0 %v1429_v9 }
 0x2cf   :  { %1260 = vmatprep.subr.bf16.mxu0 %v1378_v3 }
 0x39c   :  { %v288_v33 = vpop.f32.mrb[2].mxu0 }
 0x39d   :  { %v293_v34 = vrot.slane %v288_v33, 6  ;;  %v1152_v35 = vpop.f32.mrb[3].mxu0 }
 0x39f   :  { %v295_v36 = vadd.f32 %v293_v34, %v1455_v15 }
 0x3a1   :  { %1298 = vtanh.f32 %v295_v36  ;;  %v1063_v38 = vmul.f32 -1.442695, %v295_v36 }
 0x3a3   :  { %1300 = vpow2.f32 %v1063_v38 }
 0x3ab   :  { %v1299_v37 = vpop.eup %1298 }
 0x3ac   :  { %308 = vrot.lane.b32.xlu0 %v1299_v37, %s1381_s27 }
 0x3ad   :  { %v1301_v39 = vpop.eup %1300 }
 0x3ae   :  { %v299_v40 = vadd.f32 1.0, %v1301_v39 }
 0x3b0   :  { %1302 = vrcp.f32 %v299_v40 }
 0x3ba   :  { %v1303_v41 = vpop.eup %1302 }
 0x3bb   :  { %v306_v45 = vmul.f32 %v1303_v41, %v304_v44 }
 0x41e   :  { %v309_v42 = vpop.permute.xlu0 %308 }
 0x41f   :  { %v311_v43 = vmul.f32 %v1303_v41, %v309_v42 }
 0x421   :  { %313 = vrot.lane.b32.xlu1 %v311_v43, %s1381_s27 }
 0x493   :  { %v314_v46 = vpop.permute.xlu1 %313 }
 0x494   :  { %v316_v47 = vadd.f32 %v314_v46, %v306_v45 }
 0x496   :  { %1304 = vtanh.f32 %v316_v47  ;;  %v411_v0 = vrot.slane %v316_v47, 6 }
 0x4a0   :  { %v1305_v48 = vpop.eup %1304 }
 0x4a1   :  { %319 = vrot.lane.b32.xlu0 %v1305_v48, %s1381_s27 }
 0x513   :  { %v320_v49 = vpop.permute.xlu0 %319 }
 0x514   :  { %v322_v50 = vmul.f32 %v1303_v41, %v320_v49 }
 0x516   :  { %v324_v51 = vrot.slane %v322_v50, 2 }
 0x518   :  { %325 = vrot.lane.b32.xlu1 %v324_v51, %s1382_s1 }
 0x58a   :  { %v326_v52 = vpop.permute.xlu1 %325 }
 0x58b   :  { %1162 = vmatmul.mubr.msk.f32.vlgmr.msra.gmra.mrb[2].mxu1 %vm118_vm3, %v326_v52 }
 0x58c   :  { %1256 = vmatpush3.bf16.msra.mxu1 %v1414_v4  ;;  %1183 = vmatprep.mubr.msk.f32.mxu1 %vm1379_vm2, %v1380_v10 }
 0x58d   :  { %1257 = vmatprep.subr.bf16.mxu1 %v1378_v3 }
 0x590   :  { %1259 = vmatpush3.bf16.msra.mxu1 %v1429_v9 }
 0x591   :  { %1266 = vmatprep.subr.bf16.mxu1 %v1378_v3 }
 0x65e   :  { %v395_v53 = vpop.f32.mrb[2].mxu1 }
 0x65f   :  { %v400_v54 = vrot.slane %v395_v53, 4  ;;  %v1163_v55 = vpop.f32.mrb[3].mxu1 }
 0x661   :  { %v402_v56 = vadd.f32 %v400_v54, %v1455_v15 }
 0x663   :  { %1306 = vtanh.f32 %v402_v56  ;;  %v1065_v58 = vmul.f32 -1.442695, %v402_v56 }
 0x665   :  { %1308 = vpow2.f32 %v1065_v58 }
 0x66d   :  { %v1307_v57 = vpop.eup %1306 }
 0x66e   :  { %415 = vrot.lane.b32.xlu0 %v1307_v57, %s1381_s27 }
 0x66f   :  { %v1309_v59 = vpop.eup %1308 }
 0x670   :  { %v406_v60 = vadd.f32 1.0, %v1309_v59 }
 0x672   :  { %1310 = vrcp.f32 %v406_v60 }
 0x67c   :  { %v1311_v61 = vpop.eup %1310 }
 0x67d   :  { %v413_v1 = vmul.f32 %v1311_v61, %v411_v0 }
 0x6e0   :  { %v416_v62 = vpop.permute.xlu0 %415 }
 0x6e1   :  { %v418_v63 = vmul.f32 %v1311_v61, %v416_v62 }
 0x6e3   :  { %420 = vrot.lane.b32.xlu1 %v418_v63, %s1381_s27 }
 0x755   :  { %v421_v2 = vpop.permute.xlu1 %420 }
 0x756   :  { %v423_v5 = vadd.f32 %v421_v2, %v413_v1 }
 0x758   :  { %1312 = vtanh.f32 %v423_v5  ;;  %v518_v26 = vrot.slane %v423_v5, 6 }
 0x762   :  { %v1313_v6 = vpop.eup %1312 }
 0x763   :  { %426 = vrot.lane.b32.xlu0 %v1313_v6, %s1381_s27 }
 0x7d5   :  { %v427_v7 = vpop.permute.xlu0 %426 }
 0x7d6   :  { %v429_v8 = vmul.f32 %v1311_v61, %v427_v7 }
 0x7d8   :  { %v431_v11 = vrot.slane %v429_v8, 4 }
 0x7da   :  { %432 = vrot.lane.b32.xlu1 %v431_v11, %s1382_s1 }
 0x84c   :  { %v433_v12 = vpop.permute.xlu1 %432 }
 0x84d   :  { %1173 = vmatmul.mubr.msk.f32.vlgmr.msra.gmra.mrb[4].mxu0 %vm118_vm3, %v433_v12 }
 0x84e   :  { %1262 = vmatpush3.bf16.msra.mxu0 %v1414_v4  ;;  %1194 = vmatprep.mubr.msk.f32.mxu0 %vm1379_vm2, %v1380_v10 }
 0x84f   :  { %1263 = vmatprep.subr.bf16.mxu0 %v1378_v3 }
 0x852   :  { %1265 = vmatpush3.bf16.msra.mxu0 %v1429_v9 }
 0x853   :  { %1272 = vmatprep.subr.bf16.mxu0 %v1378_v3 }
 0x920   :  { %v502_v14 = vpop.f32.mrb[4].mxu0 }
 0x921   :  { %v507_v16 = vrot.slane %v502_v14, 2  ;;  %v1174_v17 = vpop.f32.mrb[5].mxu0 }
 0x923   :  { %v509_v18 = vadd.f32 %v507_v16, %v1455_v15 }
 0x925   :  { %1314 = vtanh.f32 %v509_v18  ;;  %v1067_v20 = vmul.f32 -1.442695, %v509_v18 }
 0x927   :  { %1316 = vpow2.f32 %v1067_v20 }
 0x92f   :  { %v1315_v19 = vpop.eup %1314 }
 0x930   :  { %522 = vrot.lane.b32.xlu0 %v1315_v19, %s1381_s27 }
 0x931   :  { %v1317_v21 = vpop.eup %1316 }
 0x932   :  { %v513_v22 = vadd.f32 1.0, %v1317_v21 }
 0x934   :  { %1318 = vrcp.f32 %v513_v22 }
 0x93e   :  { %v1319_v23 = vpop.eup %1318 }
 0x93f   :  { %v520_v27 = vmul.f32 %v1319_v23, %v518_v26 }
 0x9a2   :  { %v523_v24 = vpop.permute.xlu0 %522 }
 0x9a3   :  { %v525_v25 = vmul.f32 %v1319_v23, %v523_v24 }
 0x9a5   :  { %527 = vrot.lane.b32.xlu1 %v525_v25, %s1381_s27 }
 0xa17   :  { %v528_v28 = vpop.permute.xlu1 %527 }
 0xa18   :  { %v530_v29 = vadd.f32 %v528_v28, %v520_v27 }
 0xa1a   :  { %1320 = vtanh.f32 %v530_v29  ;;  %v622_v44 = vrot.slane %v530_v29, 6 }
 0xa24   :  { %v1321_v15 = vpop.eup %1320 }
 0xa25   :  { %533 = vrot.lane.b32.xlu0 %v1321_v15, %s1381_s27 }
 0xa97   :  { %v534_v30 = vpop.permute.xlu0 %533 }
 0xa98   :  { %v536_v31 = vmul.f32 %v1319_v23, %v534_v30 }
 0xa9a   :  { %v538_v32 = vrot.slane %v536_v31, 6 }
 0xa9c   :  { %539 = vrot.lane.b32.xlu1 %v538_v32, %s1382_s1 }
 0xb0e   :  { %v540_v33 = vpop.permute.xlu1 %539 }
 0xb0f   :  { %1184 = vmatmul.mubr.msk.f32.vlgmr.msra.gmra.mrb[4].mxu1 %vm118_vm3, %v540_v33 }
 0xb10   :  { %1268 = vmatpush3.bf16.msra.mxu1 %v1414_v4  ;;  %1205 = vmatprep.mubr.msk.f32.mxu1 %vm1379_vm2, %v1380_v10 }
 0xb11   :  { %1269 = vmatprep.subr.bf16.mxu1 %v1378_v3 }
 0xb14   :  { %1271 = vmatpush3.bf16.msra.mxu1 %v1429_v9 }
 0xb15   :  { %1278 = vmatprep.subr.bf16.mxu1 %v1378_v3 }
 0xbe2   :  { %v609_v34 = vpop.f32.mrb[4].mxu1 }
 0xbe3   :  { %v613_v35 = vadd.f32 %v609_v34, %v1453_v13  ;;  %v1185_v36 = vpop.f32.mrb[5].mxu1 }
 0xbe5   :  { %1322 = vtanh.f32 %v613_v35  ;;  %v1069_v38 = vmul.f32 -1.442695, %v613_v35 }
 0xbe7   :  { %1324 = vpow2.f32 %v1069_v38 }
 0xbef   :  { %v1323_v37 = vpop.eup %1322 }
 0xbf0   :  { %626 = vrot.lane.b32.xlu0 %v1323_v37, %s1381_s27 }
 0xbf1   :  { %v1325_v39 = vpop.eup %1324 }
 0xbf2   :  { %v617_v40 = vadd.f32 1.0, %v1325_v39 }
 0xbf4   :  { %1326 = vrcp.f32 %v617_v40 }
 0xbfe   :  { %v1327_v41 = vpop.eup %1326 }
 0xbff   :  { %v624_v45 = vmul.f32 %v1327_v41, %v622_v44 }
 0xc62   :  { %v627_v42 = vpop.permute.xlu0 %626 }
 0xc63   :  { %v629_v43 = vmul.f32 %v1327_v41, %v627_v42 }
 0xc65   :  { %631 = vrot.lane.b32.xlu1 %v629_v43, %s1381_s27 }
 0xcd7   :  { %v632_v46 = vpop.permute.xlu1 %631 }
 0xcd8   :  { %v634_v47 = vadd.f32 %v632_v46, %v624_v45  ;;  %v22_v45 = vld [vmem:[%s1566_s2 + $0x8] sm:$0xff]  ;;  %v23_v46 = vld [vmem:[%s1566_s2 + $0x10] sm:$0xff] }
 0xcda   :  { %1328 = vtanh.f32 %v634_v47 }
 0xce4   :  { %v1329_v48 = vpop.eup %1328 }
 0xce5   :  { %637 = vrot.lane.b32.xlu0 %v1329_v48, %s1381_s27  ;;  %v24_v48 = vld [vmem:[%s1566_s2 + $0x18] sm:$0xff] }
 0xd57   :  { %v638_v49 = vpop.permute.xlu0 %637 }
 0xd58   :  { %v640_v50 = vmul.f32 %v1327_v41, %v638_v49  ;;  %v1282_v49 = vpack.c.bf16 %v24_v48, %v23_v46 }
 0xd5a   :  { %642 = vrot.lane.b32.xlu1 %v640_v50, %s1382_s1 }
 0xdcc   :  { %v643_v51 = vpop.permute.xlu1 %642 }
 0xdcd   :  { %1195 = vmatmul.mubr.msk.f32.vlgmr.msra.gmra.mrb[6].mxu0 %vm118_vm3, %v643_v51 }
 0xdce   :  { %1274 = vmatpush3.bf16.msra.mxu0 %v1414_v4  ;;  %1216 = vmatprep.mubr.msk.f32.mxu0 %vm1379_vm2, %v1380_v10 }
 0xdcf   :  { %1275 = vmatprep.subr.bf16.mxu0 %v1378_v3 }
 0xdd2   :  { %1277 = vmatpush3.bf16.msra.mxu0 %v1429_v9  ;;  %v728_v9 = vrot.slane %v634_v47, 6 }
 0xea0   :  { %v712_v52 = vpop.f32.mrb[6].mxu0 }
 0xea1   :  { %v717_v53 = vrot.slane %v712_v52, 6  ;;  %v1196_v54 = vpop.f32.mrb[7].mxu0 }
 0xea3   :  { %v719_v55 = vadd.f32 %v717_v53, %v1453_v13 }
 0xea5   :  { %1330 = vtanh.f32 %v719_v55  ;;  %v1071_v57 = vmul.f32 -1.442695, %v719_v55  ;;  %v1076_v55 = vld [vmem:[%s1566_s2 + $0x20] ss:$0 sm:$0xff] }
 0xea7   :  { %1332 = vpow2.f32 %v1071_v57 }
 0xeaf   :  { %v1331_v56 = vpop.eup %1330 }
 0xeb0   :  { %732 = vrot.lane.b32.xlu0 %v1331_v56, %s1381_s27 }
 0xeb1   :  { %v1333_v58 = vpop.eup %1332 }
 0xeb2   :  { %v723_v4 = vadd.f32 1.0, %v1333_v58 }
 0xeb4   :  { %1334 = vrcp.f32 %v723_v4 }
 0xebe   :  { %v1335_v59 = vpop.eup %1334 }
 0xebf   :  { %v730_v62 = vmul.f32 %v1335_v59, %v728_v9 }
 0xf22   :  { %v733_v60 = vpop.permute.xlu0 %732 }
 0xf23   :  { %v735_v61 = vmul.f32 %v1335_v59, %v733_v60 }
 0xf25   :  { %737 = vrot.lane.b32.xlu1 %v735_v61, %s1381_s27 }
 0xf97   :  { %v738_v63 = vpop.permute.xlu1 %737 }
 0xf98   :  { %v740_v0 = vadd.f32 %v738_v63, %v730_v62 }
 0xf9a   :  { %1336 = vtanh.f32 %v740_v0 }
 0xfa4   :  { %v1337_v1 = vpop.eup %1336 }
 0xfa5   :  { %743 = vrot.lane.b32.xlu0 %v1337_v1, %s1381_s27 }
0x1017   :  { %v744_v2 = vpop.permute.xlu0 %743 }
0x1018   :  { %v746_v5 = vmul.f32 %v1335_v59, %v744_v2 }
0x101a   :  { %v748_v6 = vrot.slane %v746_v5, 2 }
0x101c   :  { %749 = vrot.lane.b32.xlu1 %v748_v6, %s1382_s1 }
0x108e   :  { %v750_v7 = vpop.permute.xlu1 %749 }
0x108f   :  { %1206 = vmatmul.mubr.msk.f32.vlgmr.msra.gmra.mrb[6].mxu1 %vm118_vm3, %v750_v7 }
0x1090   :  { %1227 = vmatprep.mubr.msk.f32.mxu1 %vm1379_vm2, %v1380_v10  ;;  %v835_v10 = vrot.slane %v740_v0, 6 }
0x1162   :  { %v819_v8 = vpop.f32.mrb[6].mxu1 }
0x1163   :  { %v824_v11 = vrot.slane %v819_v8, 4  ;;  %v1207_v12 = vpop.f32.mrb[7].mxu1 }
0x1165   :  { %v826_v14 = vadd.f32 %v824_v11, %v1453_v13 }
0x1167   :  { %1338 = vtanh.f32 %v826_v14  ;;  %v1073_v17 = vmul.f32 -1.442695, %v826_v14 }
0x1169   :  { %1340 = vpow2.f32 %v1073_v17 }
0x1171   :  { %v1339_v16 = vpop.eup %1338 }
0x1172   :  { %839 = vrot.lane.b32.xlu0 %v1339_v16, %s1381_s27 }
0x1173   :  { %v1341_v18 = vpop.eup %1340 }
0x1174   :  { %v830_v19 = vadd.f32 1.0, %v1341_v18 }
0x1176   :  { %1342 = vrcp.f32 %v830_v19 }
0x1180   :  { %v1343_v20 = vpop.eup %1342 }
0x1181   :  { %v837_v23 = vmul.f32 %v1343_v20, %v835_v10 }
0x11e4   :  { %v840_v21 = vpop.permute.xlu0 %839 }
0x11e5   :  { %v842_v22 = vmul.f32 %v1343_v20, %v840_v21 }
0x11e7   :  { %844 = vrot.lane.b32.xlu1 %v842_v22, %s1381_s27 }
0x1259   :  { %v845_v24 = vpop.permute.xlu1 %844 }
0x125a   :  { %v847_v25 = vadd.f32 %v845_v24, %v837_v23 }
0x125c   :  { %1344 = vtanh.f32 %v847_v25  ;;  %v942_v41 = vrot.slane %v847_v25, 6 }
0x1266   :  { %v1345_v26 = vpop.eup %1344 }
0x1267   :  { %850 = vrot.lane.b32.xlu0 %v1345_v26, %s1381_s27 }
0x12d9   :  { %v851_v27 = vpop.permute.xlu0 %850 }
0x12da   :  { %v853_v28 = vmul.f32 %v1343_v20, %v851_v27 }
0x12dc   :  { %v855_v29 = vrot.slane %v853_v28, 4 }
0x12de   :  { %856 = vrot.lane.b32.xlu1 %v855_v29, %s1382_s1 }
0x1350   :  { %v857_v15 = vpop.permute.xlu1 %856 }
0x1351   :  { %1217 = vmatmul.mubr.msk.f32.vlgmr.msra.gmra.mrb[8].mxu0 %vm118_vm3, %v857_v15 }
0x1424   :  { %v926_v30 = vpop.f32.mrb[8].mxu0 }
0x1425   :  { %v931_v31 = vrot.slane %v926_v30, 2  ;;  %v1218_v32 = vpop.f32.mrb[9].mxu0 }
0x1427   :  { %v933_v33 = vadd.f32 %v931_v31, %v1453_v13  ;;  %v21_v13 = vld [vmem:[%s1566_s2] sm:$0xff] }
0x1428   :  { %v1279_v47 = vpack.c.bf16 %v22_v45, %v21_v13 }
0x1429   :  { %1346 = vtanh.f32 %v933_v33  ;;  %v1075_v35 = vmul.f32 -1.442695, %v933_v33 }
0x142a   :  { %1280 = vmatpush3.bf16.msra.mxu1 %v1279_v47 }
0x142b   :  { %1348 = vpow2.f32 %v1075_v35  ;;  %1281 = vmatprep.subr.bf16.mxu1 %v1378_v3 }
0x142e   :  { %1283 = vmatpush3.bf16.msra.mxu1 %v1282_v49 }
0x1433   :  { %v1347_v34 = vpop.eup %1346 }
0x1434   :  { %946 = vrot.lane.b32.xlu0 %v1347_v34, %s1381_s27 }
0x1435   :  { %v1349_v36 = vpop.eup %1348 }
0x1436   :  { %v937_v37 = vadd.f32 1.0, %v1349_v36 }
0x1438   :  { %1350 = vrcp.f32 %v937_v37 }
0x1442   :  { %v1351_v38 = vpop.eup %1350 }
0x1443   :  { %v944_v42 = vmul.f32 %v1351_v38, %v942_v41 }
0x14a6   :  { %v947_v39 = vpop.permute.xlu0 %946 }
0x14a7   :  { %v949_v40 = vmul.f32 %v1351_v38, %v947_v39 }
0x14a9   :  { %951 = vrot.lane.b32.xlu1 %v949_v40, %s1381_s27 }
0x151b   :  { %v952_v43 = vpop.permute.xlu1 %951 }
0x151c   :  { %v954_v44 = vadd.f32 %v952_v43, %v944_v42 }
0x151e   :  { %1352 = vtanh.f32 %v954_v44 }
0x1528   :  { %v1353_v50 = vpop.eup %1352 }
0x1529   :  { %957 = vrot.lane.b32.xlu0 %v1353_v50, %s1381_s27 }
0x159b   :  { %v958_v51 = vpop.permute.xlu0 %957 }
0x159c   :  { %v960_v52 = vmul.f32 %v1351_v38, %v958_v51 }
0x159e   :  { %v966_v53 = vrot.slane %v960_v52, 6 }
0x15a0   :  { %967 = vrot.lane.b32.xlu1 %v966_v53, %s1382_s1 }
0x1612   :  { %v968_v54 = vpop.permute.xlu1 %967 }
0x1613   :  { %1228 = vmatmul.mubr.msk.f32.vlgmr.msra.gmra.mrb[8].mxu1 %vm118_vm3, %v968_v54 }
0x16e6   :  { %v1037_v56 = vpop.f32.mrb[8].mxu1 }
0x16e7   :  { %v1038_v3 = vadd.f32 %v1076_v55, %v1037_v56  ;;  %v1229_v57 = vpop.f32.mrb[9].mxu1 }
0x16e9   :  { %1042 = vst.msk [vmem:[#allocation2] sm:$0x3] %vm1041_vm4, %v1038_v3 }
0x16ea   :  { %1365 = shalt.err (!%p1362_p4)
}
0x16eb   :  { %s1366_s16 = scalar_lea.hbm %s1567_s3, 32 }
0x16ec   :  { %p1367_p5 = scmp.ne.s32.totalorder %s1567_s3, %s1366_s16  ;;  %p1370_p6 = scmp.lt.u32.totalorder %s1366_s16, %s1567_s3 }
0x16ee   :  { %p1372_p7 = pnand %p1370_p6, %p1367_p5 }
0x16f0   :  { %1375 = shalt.err (!%p1372_p7)
}
0x16f1   :  { %1052 = dma.vmem_to_hbm [thread:$0]  %s1050_s12, 32, %s1567_s3, [#allocation3]  }
0x16f2   :  { %1376 = dma.done.wait [#allocation3], 32  }
0x16f3   :  { %1377 = vsyncadd [#allocation3], 4294967264 }
0x16f4   :  { %1056 = vsyncpa [#allocation3], 1 }

</bundles_post_ra>
